<compile_context>
chip_gen: v5e
topology: v5e:2x2
jax: 0.10.0
libtpu: 0.0.40
codegen_flags: <defaults>
</compile_context>

<pallas_src>
import functools

import jax
import jax.numpy as jnp
from jax import lax
from jax.experimental import pallas as pl
from jax.experimental.pallas import tpu as pltpu

# Module hyper-parameters from __init__ (lambda_mean = lambda_cov = 1).
LAMBDA_MEAN = 1.0
LAMBDA_COV = 1.0

_MAX_BLOCK_LANES = 2048  # batch elements (lanes) per grid step; multiple of 128


def _pnn_loss_kernel(mean_ref, logvar_ref, tgt_ref, params_ref, psum_ref,
                     *, batch, block_lanes, need_mask):
    f32 = jnp.float32
    mean = mean_ref[...].astype(f32)       # (D, TB)  batch on lanes
    lraw = logvar_ref[...].astype(f32)     # (D, TB)  raw log-variance
    tgt = tgt_ref[...].astype(f32)         # (D, TB)

    p = params_ref[...]                    # (D, 3) f32, resident across the grid
    maxlv = p[:, 0:1]                      # (D, 1) -> broadcasts along lanes
    minlv = p[:, 1:2]
    qscale = p[:, 2:3]                     # LAMBDA_MEAN * scalers * exp(-min_logvar)

    # Bound 1: lv1 = maxlv - softplus(maxlv - lraw), stable softplus:
    #   softplus(x) = max(x, 0) + log(1 + exp(-|x|))
    w = maxlv - lraw
    sp_w = jnp.maximum(w, 0.0) + jnp.log(1.0 + jnp.exp(-jnp.abs(w)))
    # Bound 2 operates on z = lv1 - minlv = (maxlv - minlv) - sp_w.
    z = (maxlv - minlv) - sp_w
    e = jnp.exp(-jnp.abs(z))
    sp_z = jnp.maximum(z, 0.0) + jnp.log(1.0 + e)
    # exp(-softplus(z)) reuses e instead of spending a third transcendental:
    #   z >= 0 : e / (1 + e)        z < 0 : 1 / (1 + e)
    inv_sp = jnp.where(z >= 0.0, e, 1.0) / (1.0 + e)

    diff = mean - tgt
    # quad = lambda_mean * (diff * scalers) * (diff / var); exp(-min_logvar) and
    # lambda_mean are already folded into qscale (wrapper-side).
    quad = (diff * diff) * qscale * inv_sp
    logv = minlv + sp_z                                  # bounded log-variance
    terms = quad + (logv if LAMBDA_COV == 1.0 else LAMBDA_COV * logv)

    if need_mask:  # static Python bool: only emitted when B % TB != 0
        col = (pl.program_id(0) * block_lanes
               + lax.broadcasted_iota(jnp.int32, (1, block_lanes), 1))
        terms = jnp.where(col < batch, terms, 0.0)

    # Lane-dense per-block partial sums (reduce over D only); the cross-lane /
    # cross-block finish is a trivial XLA sum in the wrapper.
    psum_ref[...] = jnp.sum(terms, axis=0, keepdims=True).reshape(
        1, 1, block_lanes)


@jax.jit
def pnn_loss_gaussian(output, target, max_logvar, min_logvar, scalers=None):
    """JAX wrapper matching PNNLoss_Gaussian.forward. Returns a scalar f32 loss."""
    b, d2 = output.shape
    d = d2 // 2
    if scalers is None:
        scalers = jnp.ones((d,), jnp.float32)

    # Lane-dense layout: batch -> lanes, feature dim -> sublanes.  Native dtype
    # is preserved (the cast to f32 happens inside the kernel, after the DMA).
    mean_t = output[:, :d].T                            # (d, b)
    logvar_t = output[:, d:].T                          # (d, b)
    target_t = jnp.broadcast_to(target, (b, d)).T       # (d, b)  (expand_as)

    maxlv = jnp.reshape(max_logvar, (d,)).astype(jnp.float32)
    minlv = jnp.reshape(min_logvar, (d,)).astype(jnp.float32)
    sc = jnp.reshape(scalers, (d,)).astype(jnp.float32)
    # Fold lambda_mean and exp(-min_logvar) into one per-feature scale so the
    # kernel never rebuilds exp(-logvar) with an extra transcendental.
    qscale = (LAMBDA_MEAN * sc) * jnp.exp(-minlv)
    params = jnp.stack([maxlv, minlv, qscale], axis=1)  # (d, 3) f32

    tb = min(_MAX_BLOCK_LANES, ((b + 127) // 128) * 128)  # lanes per grid step
    nb = -(-b // tb)                                       # number of blocks
    need_mask = nb * tb != b

    kernel = functools.partial(_pnn_loss_kernel, batch=b, block_lanes=tb,
                               need_mask=need_mask)
    feat_spec = pl.BlockSpec((d, tb), lambda j: (0, j))

    partials = pl.pallas_call(
        kernel,
        out_shape=jax.ShapeDtypeStruct((nb, 1, tb), jnp.float32),
        grid_spec=pltpu.PrefetchScalarGridSpec(
            num_scalar_prefetch=0,
            grid=(nb,),
            in_specs=[feat_spec, feat_spec, feat_spec,
                      pl.BlockSpec((d, 3), lambda j: (0, 0))],
            out_specs=pl.BlockSpec((1, 1, tb), lambda j: (j, 0, 0)),
        ),
        compiler_params=pltpu.CompilerParams(
            # Independent batch blocks: lets v7x shard the grid over its 2 TCs.
            dimension_semantics=("parallel",),
        ),
    )(mean_t, logvar_t, target_t, params)

    return jnp.sum(partials)


def _softplus(x):
    return jnp.maximum(x, 0.0) + jnp.log(1.0 + jnp.exp(-jnp.abs(x)))


def pnn_loss_reference(output, target, max_logvar, min_logvar, scalers):
    """Pure-JAX mirror of the torch forward for a correctness check."""
    d = output.shape[1] // 2
    mean = output[:, :d].astype(jnp.float32)
    logvar = output[:, d:].astype(jnp.float32)
    logvar = max_logvar - _softplus(max_logvar - logvar)
    logvar = min_logvar + _softplus(logvar - min_logvar)
    var = jnp.exp(logvar)
    diff = mean - target
    a = diff * scalers
    bb = diff / var
    quad = jnp.sum(a * bb, axis=1)
    logdet = jnp.log(jnp.abs(jnp.prod(var, axis=1)))
    return jnp.sum(LAMBDA_MEAN * quad + LAMBDA_COV * logdet)


if __name__ == "__main__":
    # Module default idx has length 9 -> d = 9 state dims; scalers = ones(9).
    B, D = 8, 9
    key = jax.random.PRNGKey(0)
    k1, k2, k3, k4 = jax.random.split(key, 4)

    output = jax.random.normal(k1, (B, 2 * D), dtype=jnp.float32)
    target = jax.random.normal(k2, (B, D), dtype=jnp.float32)
    # Deterministic logvar bounds (trainable params in a real PNN).
    max_logvar = 0.5 + 0.1 * jax.random.uniform(k3, (1, D), dtype=jnp.float32)
    min_logvar = -0.5 - 0.1 * jax.random.uniform(k4, (1, D), dtype=jnp.float32)
    scalers = jnp.ones((D,), dtype=jnp.float32)  # torch.tensor([1]*9)

    loss = pnn_loss_gaussian(output, target, max_logvar, min_logvar, scalers)
    loss = jax.block_until_ready(loss)

    ref = jax.block_until_ready(
        pnn_loss_reference(output, target, max_logvar, min_logvar, scalers))
    assert jnp.allclose(loss, ref, rtol=1e-5, atol=1e-4), (loss, ref)

    print("KERNEL_OK")
</pallas_src>

<mosaic_0001>
module attributes {stable_mosaic.version = 11 : i64} {
  func.func @_pnn_loss_kernel(%arg0: i32, %arg1: memref<9x128xf32, #tpu.memory_space<vmem>>, %arg2: memref<9x128xf32, #tpu.memory_space<vmem>>, %arg3: memref<9x128xf32, #tpu.memory_space<vmem>>, %arg4: memref<9x3xf32, #tpu.memory_space<vmem>>, %arg5: memref<1x1x128xf32, #tpu.memory_space<vmem>>) attributes {dimension_semantics = [#tpu.dimension_semantics<parallel>], iteration_bounds = array<i64: 1>, scalar_prefetch = 0 : i64, scratch_operands = 0 : i64, tpu.core_type = #tpu.core_type<tc>, window_params = [{transform_indices = @transform_0, window_bounds = array<i64: 9, 128>}, {transform_indices = @transform_1, window_bounds = array<i64: 9, 128>}, {transform_indices = @transform_2, window_bounds = array<i64: 9, 128>}, {pipeline_mode = #tpu.pipeline_mode<synchronous>, transform_indices = @transform_3, window_bounds = array<i64: 9, 3>}, {transform_indices = @transform_4, window_bounds = array<i64: 1, 1, 128>}]} {
    %c0 = arith.constant 0 : index
    %c0_0 = arith.constant 0 : index
    %0 = vector.load %arg1[%c0, %c0_0] : memref<9x128xf32, #tpu.memory_space<vmem>>, vector<9x128xf32>
    %c0_1 = arith.constant 0 : index
    %c0_2 = arith.constant 0 : index
    %1 = vector.load %arg2[%c0_1, %c0_2] : memref<9x128xf32, #tpu.memory_space<vmem>>, vector<9x128xf32>
    %c0_3 = arith.constant 0 : index
    %c0_4 = arith.constant 0 : index
    %2 = vector.load %arg3[%c0_3, %c0_4] : memref<9x128xf32, #tpu.memory_space<vmem>>, vector<9x128xf32>
    %c0_5 = arith.constant 0 : index
    %c0_6 = arith.constant 0 : index
    %3 = vector.load %arg4[%c0_5, %c0_6] : memref<9x3xf32, #tpu.memory_space<vmem>>, vector<9x3xf32>
    %4 = vector.extract_strided_slice %3 {offsets = [0, 0], sizes = [9, 1], strides = [1, 1]} : vector<9x3xf32> to vector<9x1xf32>
    %5 = vector.extract_strided_slice %3 {offsets = [0, 1], sizes = [9, 1], strides = [1, 1]} : vector<9x3xf32> to vector<9x1xf32>
    %6 = vector.extract_strided_slice %3 {offsets = [0, 2], sizes = [9, 1], strides = [1, 1]} : vector<9x3xf32> to vector<9x1xf32>
    %7 = vector.broadcast %4 : vector<9x1xf32> to vector<9x128xf32>
    %8 = arith.subf %7, %1 : vector<9x128xf32>
    %cst = arith.constant 0.000000e+00 : f32
    %9 = vector.broadcast %cst : f32 to vector<9x128xf32>
    %10 = arith.maximumf %8, %9 : vector<9x128xf32>
    %11 = math.absf %8 : vector<9x128xf32>
    %cst_7 = arith.constant 0.000000e+00 : f32
    %12 = vector.broadcast %cst_7 : f32 to vector<9x128xf32>
    %13 = arith.subf %12, %11 : vector<9x128xf32>
    %14 = math.exp %13 : vector<9x128xf32>
    %cst_8 = arith.constant 1.000000e+00 : f32
    %15 = vector.broadcast %cst_8 : f32 to vector<9x128xf32>
    %16 = arith.addf %15, %14 : vector<9x128xf32>
    %17 = math.log %16 : vector<9x128xf32>
    %18 = arith.addf %10, %17 : vector<9x128xf32>
    %19 = arith.subf %4, %5 : vector<9x1xf32>
    %20 = vector.broadcast %19 : vector<9x1xf32> to vector<9x128xf32>
    %21 = arith.subf %20, %18 : vector<9x128xf32>
    %22 = math.absf %21 : vector<9x128xf32>
    %cst_9 = arith.constant 0.000000e+00 : f32
    %23 = vector.broadcast %cst_9 : f32 to vector<9x128xf32>
    %24 = arith.subf %23, %22 : vector<9x128xf32>
    %25 = math.exp %24 : vector<9x128xf32>
    %cst_10 = arith.constant 0.000000e+00 : f32
    %26 = vector.broadcast %cst_10 : f32 to vector<9x128xf32>
    %27 = arith.maximumf %21, %26 : vector<9x128xf32>
    %cst_11 = arith.constant 1.000000e+00 : f32
    %28 = vector.broadcast %cst_11 : f32 to vector<9x128xf32>
    %29 = arith.addf %28, %25 : vector<9x128xf32>
    %30 = math.log %29 : vector<9x128xf32>
    %31 = arith.addf %27, %30 : vector<9x128xf32>
    %cst_12 = arith.constant 0.000000e+00 : f32
    %32 = vector.broadcast %cst_12 : f32 to vector<9x128xf32>
    %33 = arith.cmpf oge, %21, %32 : vector<9x128xf32>
    %cst_13 = arith.constant 1.000000e+00 : f32
    %34 = vector.broadcast %cst_13 : f32 to vector<9x128xf32>
    %35 = arith.select %33, %25, %34 : vector<9x128xi1>, vector<9x128xf32>
    %cst_14 = arith.constant 1.000000e+00 : f32
    %36 = vector.broadcast %cst_14 : f32 to vector<9x128xf32>
    %37 = arith.addf %36, %25 : vector<9x128xf32>
    %38 = arith.divf %35, %37 : vector<9x128xf32>
    %39 = arith.subf %0, %2 : vector<9x128xf32>
    %40 = arith.mulf %39, %39 : vector<9x128xf32>
    %41 = vector.broadcast %6 : vector<9x1xf32> to vector<9x128xf32>
    %42 = arith.mulf %40, %41 : vector<9x128xf32>
    %43 = arith.mulf %42, %38 : vector<9x128xf32>
    %44 = vector.broadcast %5 : vector<9x1xf32> to vector<9x128xf32>
    %45 = arith.addf %44, %31 : vector<9x128xf32>
    %46 = arith.addf %43, %45 : vector<9x128xf32>
    %c128_i32 = arith.constant 128 : i32
    %47 = arith.muli %arg0, %c128_i32 : i32
    %48 = tpu.iota {dimensions = array<i32: 1>} : vector<1x128xi32>
    %49 = vector.broadcast %47 : i32 to vector<1x128xi32>
    %50 = arith.addi %49, %48 : vector<1x128xi32>
    %c8_i32 = arith.constant 8 : i32
    %51 = vector.broadcast %c8_i32 : i32 to vector<1x128xi32>
    %52 = arith.cmpi slt, %50, %51 : vector<1x128xi32>
    %cst_15 = arith.constant 0.000000e+00 : f32
    %53 = vector.shape_cast %52 : vector<1x128xi1> to vector<1x128xi1>
    %54 = vector.broadcast %53 : vector<1x128xi1> to vector<9x128xi1>
    %55 = vector.broadcast %cst_15 : f32 to vector<9x128xf32>
    %56 = arith.select %54, %46, %55 : vector<9x128xi1>, vector<9x128xf32>
    %cst_16 = arith.constant dense<0.000000e+00> : vector<128xf32>
    %57 = vector.multi_reduction <add>, %56, %cst_16 [0] : vector<9x128xf32> to vector<128xf32>
    %58 = vector.shape_cast %57 : vector<128xf32> to vector<1x128xf32>
    %59 = vector.shape_cast %58 : vector<1x128xf32> to vector<1x1x128xf32>
    %c0_17 = arith.constant 0 : index
    %c0_18 = arith.constant 0 : index
    %c0_19 = arith.constant 0 : index
    %60 = vector.load %arg5[%c0_17, %c0_18, %c0_19] : memref<1x1x128xf32, #tpu.memory_space<vmem>>, vector<1x1x128xf32>
    tpu.vector_store %arg5[%c0_17, %c0_18, %c0_19], %59 {strides = array<i32>} : memref<1x1x128xf32, #tpu.memory_space<vmem>>, vector<1x1x128xf32>,
    return
  }
  func.func @transform_0(%arg0: i32) -> (i32, i32) {
    %c0_i32 = arith.constant 0 : i32
    %c0_i32_0 = arith.constant 0 : i32
    return %c0_i32, %arg0 : i32, i32
  }
  func.func @transform_1(%arg0: i32) -> (i32, i32) {
    %c0_i32 = arith.constant 0 : i32
    %c0_i32_0 = arith.constant 0 : i32
    return %c0_i32, %arg0 : i32, i32
  }
  func.func @transform_2(%arg0: i32) -> (i32, i32) {
    %c0_i32 = arith.constant 0 : i32
    %c0_i32_0 = arith.constant 0 : i32
    return %c0_i32, %arg0 : i32, i32
  }
  func.func @transform_3(%arg0: i32) -> (i32, i32) {
    %c0_i32 = arith.constant 0 : i32
    %c0_i32_0 = arith.constant 0 : i32
    %c0_i32_1 = arith.constant 0 : i32
    return %c0_i32, %c0_i32_0 : i32, i32
  }
  func.func @transform_4(%arg0: i32) -> (i32, i32, i32) {
    %c0_i32 = arith.constant 0 : i32
    %c0_i32_0 = arith.constant 0 : i32
    %c0_i32_1 = arith.constant 0 : i32
    return %arg0, %c0_i32, %c0_i32_0 : i32, i32, i32
  }
}

</mosaic_0001>

<bundles_post_ra>
// kernel: pnn_loss_gaussian.1
= control target key start
LH: loop header
LB: loop body
LE: loop exit
PB: predicated region body
PF: predicated region fallthrough
CT: control target
= control target key end

     0   :  { %v210_v1 = vmov 0   ;;  %s211_s17 = smov 127   ;;  %v212_v3 = vmov 2   ;;  %v213_v4 = vmov 1   ;;  %vm165_vm11 = vcmask 1040384   ;;  %s271_s3 = inlined_call_operand.vmem [shape: f32[9,3], index: 3, kind: input, shape index: {}]   ;;  %s272_s1 = inlined_call_operand.vmem [shape: f32[9,8], index: 1, kind: input, shape index: {}]   ;;  %s273_s0 = inlined_call_operand.vmem [shape: f32[9,8], index: 0, kind: input, shape index: {}]   ;;  %s274_s2 = inlined_call_operand.vmem [shape: f32[9,8], index: 2, kind: input, shape index: {}]   ;;  %s275_s4 = inlined_call_operand.vmem [shape: f32[1,1,128], index: 4, kind: output, shape index: {}]  }
   0x1   :  { %v24_v0 = vld [vmem:[%s271_s3 + $0x8] sm:$0x1]  ;;  %183 = vset.pattern.permute.xlu1 %v210_v1  ;;  %184 = vset.pattern.permute.xlu2 %v210_v1  ;;  %v23_v2 = vld [vmem:[%s271_s3] sm:$0xff] }
   0x2   :  { %57 = vrot.lane.b32.xlu0 %v24_v0, %s211_s17  ;;  %32 = vperm.xlu1 %183, %v24_v0   ;;  %v20_v10 = vld [vmem:[%s272_s1 + $0x8] sm:$0x1]  ;;  %v19_v14 = vld [vmem:[%s272_s1] sm:$0xff] }
   0x3   :  { %185 = vset.pattern.permute.xlu0 %v212_v3  ;;  %v18_v46 = vld [vmem:[%s273_s0 + $0x8] sm:$0x1]  ;;  %v17_v55 = vld [vmem:[%s273_s0] sm:$0xff] }
   0x4   :  { %v22_v47 = vld [vmem:[%s274_s2 + $0x8] sm:$0x1]  ;;  %v21_v56 = vld [vmem:[%s274_s2] sm:$0xff] }
   0x5   :  { %v128_v51 = vsub.f32 %v18_v46, %v22_v47 }
   0x7   :  { %v130_v59 = vmul.f32 %v128_v51, %v128_v51 }
   0xa   :  { %55 = vrot.lane.b32.xlu0 %v23_v2, %s211_s17  ;;  %27 = vperm.xlu1 %183, %v23_v2  }
  0x12   :  { %186 = vset.pattern.permute.xlu1 %v212_v3  ;;  %136 = vperm.xlu0 %185, %v24_v0  }
  0x13   :  { %132 = vperm.xlu1 %186, %v23_v2  }
  0x1a   :  { %189 = vset.pattern.permute.xlu0 %v213_v4 }
  0x1b   :  { %188 = vset.pattern.permute.xlu1 %v213_v4 }
  0x1c   :  { %144 = vperm.xlu1 %188, %v23_v2  }
  0x74   :  { %v58_v5 = vpop.permute.xlu0 %57  ;;  %v33_v9 = vpop.permute.xlu1 %32 }
  0x75   :  { %v62_v6 = vsub.f32 %v24_v0, %v58_v5  ;;  %v36_v11 = vsub.f32 %v33_v9, %v20_v10 }
  0x77   :  { %70 = vperm.xlu2 %184, %v62_v6   ;;  %v40_v12 = vand.u32 2147483647, %v36_v11  ;;  %v38_v26 = vmax.f32 %v36_v11, 0.0 }
  0x79   :  { %v42_v15 = vsub.f32 0.0, %v40_v12  ;;  %v156_v12 = vlaneseq }
  0x7b   :  { %v45_v17 = vmul.f32 1.442695, %v42_v15 }
  0x7c   :  { %v56_v7 = vpop.permute.xlu0 %55  ;;  %v28_v13 = vpop.permute.xlu1 %27 }
  0x7d   :  { %v61_v8 = vsub.f32 %v23_v2, %v56_v7  ;;  %v35_v16 = vsub.f32 %v28_v13, %v19_v14  ;;  %190 = vpow2.f32 %v45_v17 }
  0x7f   :  { %65 = vperm.xlu2 %184, %v61_v8   ;;  %v39_v18 = vand.u32 2147483647, %v35_v16  ;;  %v37_v32 = vmax.f32 %v35_v16, 0.0 }
  0x81   :  { %v41_v19 = vsub.f32 0.0, %v39_v18 }
  0x83   :  { %v43_v20 = vmul.f32 1.442695, %v41_v19  ;;  %v191_v21 = vpop.eup %190 }
  0x84   :  { %v48_v22 = vadd.f32 1.0, %v191_v21  ;;  %v137_v60 = vpop.permute.xlu0 %136 }
  0x85   :  { %192 = vpow2.f32 %v43_v20  ;;  %v133_v63 = vpop.permute.xlu1 %132  ;;  %v140_v9 = vmul.f32 %v137_v60, %v130_v59 }
  0x86   :  { %194 = vlog2.f32 %v48_v22  ;;  %v157_v22 = vand.u32 127, %v156_v12 }
  0x87   :  { %187 = vset.pattern.permute.xlu2 %v213_v4 }
  0x88   :  { %148 = vperm.xlu2 %187, %v24_v0   ;;  %v127_v0 = vsub.f32 %v17_v55, %v21_v56  ;;  %vm160_vm10 = vcmp.lt.s32.totalorder %v157_v22, 8 }
  0x8a   :  { %v129_v19 = vmul.f32 %v127_v0, %v127_v0 }
  0x8b   :  { %v193_v23 = vpop.eup %192 }
  0x8c   :  { %v47_v24 = vadd.f32 1.0, %v193_v23  ;;  %v195_v25 = vpop.eup %194 }
  0x8d   :  { %v52_v27 = vmul.f32 0.6931472, %v195_v25 }
  0x8e   :  { %196 = vlog2.f32 %v47_v24 }
  0x8f   :  { %v54_v28 = vadd.f32 %v52_v27, %v38_v26 }
  0x94   :  { %v197_v29 = vpop.eup %196 }
  0x95   :  { %v50_v34 = vmul.f32 0.6931472, %v197_v29 }
  0x97   :  { %v53_v37 = vadd.f32 %v50_v34, %v37_v32 }
  0xd1   :  { %v71_v30 = vpop.permute.xlu2 %70 }
  0xd2   :  { %v74_v31 = vsub.f32 %v71_v30, %v54_v28 }
  0xd4   :  { %v76_v33 = vand.u32 2147483647, %v74_v31  ;;  %vm94_vm3 = vcmp.ge.f32.partialorder %v74_v31, 0.0  ;;  %v84_v6 = vmax.f32 %v74_v31, 0.0  ;;  %v145_v31 = vpop.permute.xlu1 %144 }
  0xd6   :  { %v78_v35 = vsub.f32 0.0, %v76_v33  ;;  %v139_v33 = vmul.f32 %v133_v63, %v129_v19 }
  0xd8   :  { %v81_v36 = vmul.f32 1.442695, %v78_v35 }
  0xd9   :  { %v66_v38 = vpop.permute.xlu2 %65 }
  0xda   :  { %198 = vpow2.f32 %v81_v36  ;;  %v251_v39 = vsub.f32 %v66_v38, %v53_v37 }
  0xdc   :  { %v75_v40 = vand.u32 2147483647, %v251_v39  ;;  %v83_v23 = vmax.f32 %v251_v39, 0.0  ;;  %vm93_vm8 = vcmp.ge.f32.partialorder %v251_v39, 0.0 }
  0xde   :  { %v77_v41 = vsub.f32 0.0, %v75_v40 }
  0xe0   :  { %v199_v42 = vpop.eup %198  ;;  %v79_v43 = vmul.f32 1.442695, %v77_v41 }
  0xe1   :  { %v86_v44 = vadd.f32 1.0, %v199_v42  ;;  %v96_v7 = vsel %vm94_vm3, %v199_v42, 1.0 }
  0xe2   :  { %200 = vpow2.f32 %v79_v43  ;;  %v149_v17 = vpop.permute.xlu2 %148 }
  0xe3   :  { %202 = vrcp.f32 %v86_v44  ;;  %v123_v53 = vand.u32 2147483648, %v86_v44  ;;  %v121_v58 = vand.u32 2147483647, %v86_v44  ;;  %vm117_vm1 = vweird.f32 %v86_v44 }
  0xe4   :  { %204 = vlog2.f32 %v86_v44 }
  0xe5   :  { %v124_v2 = vor.u32 1.1754944e-38, %v123_v53  ;;  %vm122_vm4 = vcmp.eq.f32.partialorder %v121_v58, 8.507059e+37 }
  0xe8   :  { %v201_v45 = vpop.eup %200 }
  0xe9   :  { %v203_v48 = vpop.eup %202  ;;  %v85_v49 = vadd.f32 1.0, %v201_v45  ;;  %v95_v28 = vsel %vm93_vm8, %v201_v45, 1.0 }
  0xea   :  { %v113_v50 = vmul.f32 %v203_v48, %v86_v44  ;;  %v205_v54 = vpop.eup %204  ;;  %vm118_vm0 = vweird.f32 %v203_v48 }
  0xeb   :  { %206 = vrcp.f32 %v85_v49  ;;  %v90_v1 = vmul.f32 0.6931472, %v205_v54  ;;  %vm119_vm2 = vmor %vm117_vm1, %vm118_vm0  ;;  %v108_v13 = vand.u32 2147483648, %v85_v49  ;;  %v106_v16 = vand.u32 2147483647, %v85_v49 }
  0xec   :  { %v114_v52 = vsub.f32 1.0, %v113_v50  ;;  %208 = vlog2.f32 %v85_v49  ;;  %vm102_vm6 = vweird.f32 %v85_v49 }
  0xed   :  { %v92_v14 = vadd.f32 %v90_v1, %v84_v6  ;;  %v109_v24 = vor.u32 1.1754944e-38, %v108_v13  ;;  %vm107_vm9 = vcmp.eq.f32.partialorder %v106_v16, 8.507059e+37 }
  0xee   :  { %v115_v57 = vmul.f32 %v203_v48, %v114_v52 }
  0xef   :  { %v152_v25 = vadd.f32 %v149_v17, %v92_v14 }
  0xf0   :  { %v116_v61 = vadd.f32 %v203_v48, %v115_v57 }
  0xf1   :  { %v207_v62 = vpop.eup %206 }
  0xf2   :  { %v98_v3 = vmul.f32 %v207_v62, %v85_v49  ;;  %v120_v4 = vsel %vm119_vm2, %v203_v48, %v116_v61  ;;  %v209_v5 = vpop.eup %208  ;;  %vm103_vm5 = vweird.f32 %v207_v62 }
  0xf3   :  { %v125_v8 = vsel %vm122_vm4, %v124_v2, %v120_v4  ;;  %v88_v18 = vmul.f32 0.6931472, %v209_v5  ;;  %vm104_vm7 = vmor %vm102_vm6, %vm103_vm5 }
  0xf4   :  { %v99_v10 = vsub.f32 1.0, %v98_v3  ;;  %v126_v11 = vmul.f32 %v125_v8, %v96_v7 }
  0xf5   :  { %v91_v27 = vadd.f32 %v88_v18, %v83_v23 }
  0xf6   :  { %v100_v15 = vmul.f32 %v207_v62, %v99_v10  ;;  %v142_v20 = vmul.f32 %v140_v9, %v126_v11 }
  0xf7   :  { %v151_v35 = vadd.f32 %v145_v31, %v91_v27 }
  0xf8   :  { %v101_v21 = vadd.f32 %v207_v62, %v100_v15  ;;  %v154_v30 = vadd.f32 %v152_v25, %v142_v20 }
  0xfa   :  { %v105_v26 = vsel %vm104_vm7, %v207_v62, %v101_v21  ;;  %v164_v36 = vsel %vm160_vm10, %v154_v30, 0.0 }
  0xfb   :  { %v110_v29 = vsel %vm107_vm9, %v109_v24, %v105_v26  ;;  %v166_v40 = vsel %vm165_vm11, %v164_v36, 0.0 }
  0xfc   :  { %v111_v32 = vmul.f32 %v110_v29, %v95_v28 }
  0xfe   :  { %v141_v34 = vmul.f32 %v139_v33, %v111_v32 }
 0x100   :  { %v153_v37 = vadd.f32 %v151_v35, %v141_v34 }
 0x102   :  { %v163_v38 = vsel %vm160_vm10, %v153_v37, 0.0 }
 0x103   :  { %v167_v41 = vadd.f32 %v166_v40, %v163_v38 }
 0x105   :  { %v168_v42 = vrot.slane %v167_v41, 4 }
 0x107   :  { %v169_v39 = vadd.f32 %v168_v42, %v167_v41 }
 0x109   :  { %v170_v43 = vrot.slane %v169_v39, 2 }
 0x10b   :  { %v171_v44 = vadd.f32 %v170_v43, %v169_v39 }
 0x10d   :  { %v172_v46 = vrot.slane %v171_v44, 1 }
 0x10f   :  { %v173_v45 = vadd.f32 %v172_v46, %v171_v44 }
 0x111   :  { %174 = vst [vmem:[%s275_s4] sm:$0x1] %v173_v45 }

</bundles_post_ra>
